<compile_context>
chip_gen: v7x
topology: tpu7x:2x2x1
jax: 0.10.0
libtpu: 0.0.40
codegen_flags: <defaults>
</compile_context>

<pallas_src>
import functools

import jax
import jax.numpy as jnp
from jax.experimental import pallas as pl
from jax.experimental.pallas import tpu as pltpu


def _make_se_kernel(hw_actual: int):
    inv_hw = 1.0 / float(hw_actual)

    def _se_kernel(x_ref, w1t_ref, w2t_ref, o_ref):
        # x_ref : (TB, C, HWp)  batch-tile (HWp lane-padded with zeros)
        # w1t_ref: (C, Cr)      fc1.weight transposed
        # w2t_ref: (Cr, C)      fc2.weight transposed
        x = x_ref[...]                                            # (TB, C, HWp)

        # Squeeze: global average pool.  Sum over the (padded) lane axis in f32
        # and divide by the true spatial size — zero padding adds nothing.
        y = jnp.sum(x.astype(jnp.float32), axis=2) * inv_hw       # (TB, C)

        # Excitation: fc1 -> ReLU -> fc2 -> sigmoid (batched over TB).
        h = jnp.dot(y, w1t_ref[...], preferred_element_type=jnp.float32)   # (TB, Cr)
        h = jnp.maximum(h, 0.0)
        s = jnp.dot(h, w2t_ref[...], preferred_element_type=jnp.float32)   # (TB, C)
        s = jax.nn.sigmoid(s)

        # Scale: broadcast (TB, C, 1) over (TB, C, HWp).
        o_ref[...] = (x * s[:, :, None].astype(x.dtype)).astype(o_ref.dtype)

    return _se_kernel


@functools.partial(jax.jit, static_argnames=("block_bytes_budget",))
def squeeze_excitation(x, w1, w2, *, block_bytes_budget=8 * 1024 * 1024):
    """Squeeze-Excitation forward.

    x : (B, C, H, W)        activations (f32 or bf16)
    w1: (C // r, C)         PyTorch fc1.weight
    w2: (C, C // r)         PyTorch fc2.weight
    """
    B, C, H, W = x.shape
    Cr = w1.shape[0]
    HW = H * W

    # Lane-align the spatial axis (last dim multiple of 128 -> unmasked stores).
    HWp = ((HW + 127) // 128) * 128

    # Pick batch-tile TB so one f32 block stays under the budget; with
    # double-buffered input + output that is ~4x budget of pipelined VMEM,
    # safely inside v7x's 64 MiB (and v5e/v6e's 128 MiB).
    per_image_bytes = C * HWp * x.dtype.itemsize
    TB = max(1, min(B, block_bytes_budget // max(per_image_bytes, 1)))
    Bp = pl.cdiv(B, TB) * TB

    # Flatten spatial dims, zero-pad batch and lane axes.
    x_flat = x.reshape(B, C, HW)
    x_pad = jnp.pad(x_flat, ((0, Bp - B), (0, 0), (0, HWp - HW)))

    # Pre-transpose weights once in the wrapper (layout cost, not per-step work).
    w1t = w1.T  # (C, Cr)
    w2t = w2.T  # (Cr, C)

    out_pad = pl.pallas_call(
        _make_se_kernel(HW),
        out_shape=jax.ShapeDtypeStruct((Bp, C, HWp), x.dtype),
        grid_spec=pltpu.PrefetchScalarGridSpec(
            num_scalar_prefetch=0,
            grid=(Bp // TB,),
            in_specs=[
                pl.BlockSpec((TB, C, HWp), lambda b: (b, 0, 0)),
                pl.BlockSpec((C, Cr), lambda b: (0, 0)),
                pl.BlockSpec((Cr, C), lambda b: (0, 0)),
            ],
            out_specs=pl.BlockSpec((TB, C, HWp), lambda b: (b, 0, 0)),
        ),
        compiler_params=pltpu.CompilerParams(
            dimension_semantics=("parallel",),
            vmem_limit_bytes=48 * 1024 * 1024,
        ),
    )(x_pad, w1t, w2t)

    # Drop batch / lane padding and restore NCHW.
    return out_pad[:B, :, :HW].reshape(B, C, H, W)


def _reference(x, w1, w2):
    # Pure-JAX reference mirroring the PyTorch forward.
    y = jnp.mean(x.astype(jnp.float32), axis=(2, 3))        # (B, C)
    h = jnp.maximum(y @ w1.T, 0.0)                           # (B, Cr)
    s = jax.nn.sigmoid(h @ w2.T)                             # (B, C)
    return (x * s[:, :, None, None].astype(x.dtype)).astype(x.dtype)


if __name__ == "__main__":
    # Typical SE shape with a NON-128-aligned spatial size (14*14 = 196) to
    # exercise the lane-padding path.  channel=32, reduction=16 -> Cr=2.
    B, C, H, W = 2, 32, 14, 14
    reduction = 16
    Cr = C // reduction

    key = jax.random.PRNGKey(0)
    kx, k1, k2 = jax.random.split(key, 3)
    x = jax.random.normal(kx, (B, C, H, W), dtype=jnp.float32)
    w1 = jax.random.normal(k1, (Cr, C), dtype=jnp.float32) * 0.1   # fc1.weight
    w2 = jax.random.normal(k2, (C, Cr), dtype=jnp.float32) * 0.1   # fc2.weight

    out = squeeze_excitation(x, w1, w2)
    out = jax.block_until_ready(out)

    ref = _reference(x, w1, w2)
    assert out.shape == (B, C, H, W)
    assert jnp.allclose(out, ref, atol=1e-5, rtol=1e-5)

    print("KERNEL_OK")
</pallas_src>

<mosaic_0001>
module attributes {stable_mosaic.version = 11 : i64} {
  func.func @_se_kernel(%arg0: i32, %arg1: memref<2x32x256xf32, #tpu.memory_space<vmem>>, %arg2: memref<32x2xf32, #tpu.memory_space<vmem>>, %arg3: memref<2x32xf32, #tpu.memory_space<vmem>>, %arg4: memref<2x32x256xf32, #tpu.memory_space<vmem>>) attributes {dimension_semantics = [#tpu.dimension_semantics<parallel>], iteration_bounds = array<i64: 1>, scalar_prefetch = 0 : i64, scratch_operands = 0 : i64, tpu.core_type = #tpu.core_type<tc>, window_params = [{transform_indices = @transform_0, window_bounds = array<i64: 2, 32, 256>}, {pipeline_mode = #tpu.pipeline_mode<synchronous>, transform_indices = @transform_1, window_bounds = array<i64: 32, 2>}, {pipeline_mode = #tpu.pipeline_mode<synchronous>, transform_indices = @transform_2, window_bounds = array<i64: 2, 32>}, {transform_indices = @transform_3, window_bounds = array<i64: 2, 32, 256>}]} {
    %c0 = arith.constant 0 : index
    %c0_0 = arith.constant 0 : index
    %c0_1 = arith.constant 0 : index
    %0 = vector.load %arg1[%c0, %c0_0, %c0_1] : memref<2x32x256xf32, #tpu.memory_space<vmem>>, vector<2x32x256xf32>
    %cst = arith.constant dense<0.000000e+00> : vector<2x32xf32>
    %1 = vector.multi_reduction <add>, %0, %cst [2] : vector<2x32x256xf32> to vector<2x32xf32>
    %cst_2 = arith.constant 0.00510204071 : f32
    %2 = vector.broadcast %cst_2 : f32 to vector<2x32xf32>
    %3 = arith.mulf %1, %2 : vector<2x32xf32>
    %c0_3 = arith.constant 0 : index
    %c0_4 = arith.constant 0 : index
    %4 = vector.load %arg2[%c0_3, %c0_4] : memref<32x2xf32, #tpu.memory_space<vmem>>, vector<32x2xf32>
    %cst_5 = arith.constant dense<0.000000e+00> : vector<2x2xf32>
    %5 = tpu.matmul %3, %4, %cst_5 {dimension_numbers = #tpu.dot_dimension_numbers<[1], [0], [0], [1], [0, 0, 1, 1], [], []>} : vector<2x32xf32>, vector<32x2xf32>, vector<2x2xf32> -> vector<2x2xf32>
    %cst_6 = arith.constant 0.000000e+00 : f32
    %6 = vector.broadcast %cst_6 : f32 to vector<2x2xf32>
    %7 = arith.maximumf %5, %6 : vector<2x2xf32>
    %c0_7 = arith.constant 0 : index
    %c0_8 = arith.constant 0 : index
    %8 = vector.load %arg3[%c0_7, %c0_8] : memref<2x32xf32, #tpu.memory_space<vmem>>, vector<2x32xf32>
    %cst_9 = arith.constant dense<0.000000e+00> : vector<2x32xf32>
    %9 = tpu.matmul %7, %8, %cst_9 {dimension_numbers = #tpu.dot_dimension_numbers<[1], [0], [0], [1], [0, 0, 1, 1], [], []>} : vector<2x2xf32>, vector<2x32xf32>, vector<2x32xf32> -> vector<2x32xf32>
    %10 = arith.negf %9 : vector<2x32xf32>
    %11 = math.exp %10 : vector<2x32xf32>
    %cst_10 = arith.constant 1.000000e+00 : f32
    %12 = vector.broadcast %cst_10 : f32 to vector<2x32xf32>
    %13 = arith.addf %12, %11 : vector<2x32xf32>
    %14 = arith.divf %12, %13 : vector<2x32xf32>
    %15 = vector.shape_cast %14 : vector<2x32xf32> to vector<2x32x1xf32>
    %16 = vector.broadcast %15 : vector<2x32x1xf32> to vector<2x32x256xf32>
    %17 = arith.mulf %0, %16 : vector<2x32x256xf32>
    %c0_11 = arith.constant 0 : index
    %c0_12 = arith.constant 0 : index
    %c0_13 = arith.constant 0 : index
    %18 = vector.load %arg4[%c0_11, %c0_12, %c0_13] : memref<2x32x256xf32, #tpu.memory_space<vmem>>, vector<2x32x256xf32>
    tpu.vector_store %arg4[%c0_11, %c0_12, %c0_13], %17 {strides = array<i32>} : memref<2x32x256xf32, #tpu.memory_space<vmem>>, vector<2x32x256xf32>,
    return
  }
  func.func @transform_0(%arg0: i32) -> (i32, i32, i32) {
    %c0_i32 = arith.constant 0 : i32
    %c0_i32_0 = arith.constant 0 : i32
    %c0_i32_1 = arith.constant 0 : i32
    return %arg0, %c0_i32, %c0_i32_0 : i32, i32, i32
  }
  func.func @transform_1(%arg0: i32) -> (i32, i32) {
    %c0_i32 = arith.constant 0 : i32
    %c0_i32_0 = arith.constant 0 : i32
    %c0_i32_1 = arith.constant 0 : i32
    return %c0_i32, %c0_i32_0 : i32, i32
  }
  func.func @transform_2(%arg0: i32) -> (i32, i32) {
    %c0_i32 = arith.constant 0 : i32
    %c0_i32_0 = arith.constant 0 : i32
    %c0_i32_1 = arith.constant 0 : i32
    return %c0_i32, %c0_i32_0 : i32, i32
  }
  func.func @transform_3(%arg0: i32) -> (i32, i32, i32) {
    %c0_i32 = arith.constant 0 : i32
    %c0_i32_0 = arith.constant 0 : i32
    %c0_i32_1 = arith.constant 0 : i32
    return %arg0, %c0_i32, %c0_i32_0 : i32, i32, i32
  }
}

</mosaic_0001>

<bundles_post_ra>
// kernel: squeeze_excitation.1
= control target key start
LH: loop header
LB: loop body
LE: loop exit
PB: predicated region body
PF: predicated region fallthrough
CT: control target
= control target key end

     0   :  { %v395_v27 = vmov 0.0|0.0   ;;  %vm396_vm0 = vmmov 0   ;;  %v397_v31 = vmov 0.0   ;;  %v74_v32 = vlaneseq  ;;  %s601_s0 = inlined_call_operand.vmem [shape: f32[2,32,256], index: 0, kind: input, shape index: {}]   ;;  %s602_s1 = inlined_call_operand.vmem [shape: f32[32,2], index: 1, kind: input, shape index: {}]   ;;  %s603_s2 = inlined_call_operand.vmem [shape: f32[2,32], index: 2, kind: input, shape index: {}]   ;;  %s604_s3 = inlined_call_operand.vmem [shape: f32[2,32,256], index: 3, kind: output, shape index: {}]  }
   0x1   :  { %v421_v0 = vld [vmem:[%s601_s0 + $0x40] sm:$0xff]  ;;  %v426_v1 = vld [vmem:[%s601_s0 + $0x48] sm:$0xff]  ;;  %v443_v5 = vld [vmem:[%s601_s0 + $0x50] sm:$0xff]  ;;  %382 = vmatprep.subr.bf16.mxu0 %v395_v27  ;;  %374 = vmatprep.mubr.msk.f32.mxu0 %vm396_vm0, %v397_v31  ;;  %vm85_vm1 = vcmask 130112   ;;  %vm92_vm2 = vcmask 195712   ;;  %vm99_vm3 = vcmask 261312  }
   0x2   :  { %v431_v2 = vld [vmem:[%s601_s0] sm:$0xff]  ;;  %v42_v3 = vadd.f32 %v426_v1, %v421_v0  ;;  %v438_v4 = vld [vmem:[%s601_s0 + $0x8] sm:$0xff]  ;;  %v448_v6 = vld [vmem:[%s601_s0 + $0x58] sm:$0xff]  ;;  %377 = vmatprep.subr.mxu1 %v397_v31  ;;  %379 = vmatprep.mubr.msk.f32.mxu1 %vm396_vm0, %v397_v31  ;;  %v75_v34 = vand.u32 127, %v74_v32  ;;  %v526_v39 = vshrl.u32 %v74_v32, 7  ;;  %vm120_vm4 = vcmask 1041409  }
   0x3   :  { %v30_v7 = vadd.f32 %v438_v4, %v431_v2  ;;  %v455_v8 = vld [vmem:[%s601_s0 + $0x10] sm:$0xff]  ;;  %v460_v9 = vld [vmem:[%s601_s0 + $0x18] sm:$0xff]  ;;  %v45_v10 = vadd.f32 %v448_v6, %v443_v5  ;;  %v469_v12 = vld [vmem:[%s601_s0 + $0x60] sm:$0xff]  ;;  %vm122_vm5 = vcmask 261120   ;;  %vm201_vm6 = vcmask 1041408  }
   0x4   :  { %43 = vadd.xlane.f32.xlu1 %v42_v3  ;;  %v33_v11 = vadd.f32 %v460_v9, %v455_v8  ;;  %v474_v13 = vld [vmem:[%s601_s0 + $0x68] sm:$0xff]  ;;  %v479_v14 = vld [vmem:[%s601_s0 + $0x20] sm:$0xff]  ;;  %v493_v18 = vld [vmem:[%s601_s0 + $0x70] sm:$0xff]  ;;  %v80_v36 = vadd.s32 4294967288, %v75_v34  ;;  %v87_v38 = vadd.s32 4294967280, %v75_v34  ;;  %v94_v43 = vadd.s32 4294967272, %v75_v34 }
   0x5   :  { %31 = vadd.xlane.f32.xlu0 %v30_v7  ;;  %v484_v15 = vld [vmem:[%s601_s0 + $0x28] sm:$0xff]  ;;  %v48_v16 = vadd.f32 %v474_v13, %v469_v12  ;;  %v498_v19 = vld [vmem:[%s601_s0 + $0x78] sm:$0xff]  ;;  %v503_v20 = vld [vmem:[%s601_s0 + $0x30] sm:$0xff]  ;;  %v78_v47 = vsub.s32 %v75_v34, %v526_v39  ;;  %vm197_vm7 = vcmask 15360   ;;  %v283_v34 = vsub.s32 0, %v526_v39 }
   0x6   :  { %v36_v17 = vadd.f32 %v484_v15, %v479_v14  ;;  %v508_v21 = vld [vmem:[%s601_s0 + $0x38] sm:$0xff]  ;;  %v51_v22 = vadd.f32 %v498_v19, %v493_v18  ;;  %v62_v24 = vld [vmem:[%s602_s1] sm:$0xff]  ;;  %v63_v25 = vld [vmem:[%s602_s1 + $0x8] sm:$0xff]  ;;  %v83_v41 = vsub.s32 %v80_v36, %v526_v39  ;;  %v90_v45 = vsub.s32 %v87_v38, %v526_v39 }
   0x7   :  { %v39_v23 = vadd.f32 %v508_v21, %v503_v20  ;;  %v383_v26 = vpack.c.bf16 %v63_v25, %v62_v24  ;;  %v64_v28 = vld [vmem:[%s602_s1 + $0x10] sm:$0xff]  ;;  %v65_v29 = vld [vmem:[%s602_s1 + $0x18] sm:$0xff]  ;;  %v97_v54 = vsub.s32 %v94_v43, %v526_v39  ;;  %v196_v25 = vld [vmem:[%s603_s2] sm:$0x3] }
   0x8   :  { %46 = vadd.xlane.f32.xlu1 %v45_v10  ;;  %v386_v30 = vpack.c.bf16 %v65_v29, %v64_v28  ;;  %378 = vmatpush3.msk.msra.mxu1 %vm201_vm6, %v196_v25 }
   0x9   :  { %34 = vadd.xlane.f32.xlu0 %v33_v11  ;;  %384 = vmatpush3.bf16.msra.mxu0 %v383_v26 }
   0xa   :  { %385 = vmatprep.subr.bf16.mxu0 %v395_v27 }
   0xc   :  { %49 = vadd.xlane.f32.xlu1 %v48_v16 }
   0xd   :  { %37 = vadd.xlane.f32.xlu0 %v36_v17  ;;  %387 = vmatpush3.bf16.msra.mxu0 %v386_v30 }
  0x10   :  { %52 = vadd.xlane.f32.xlu1 %v51_v22 }
  0x11   :  { %40 = vadd.xlane.f32.xlu0 %v39_v23 }
  0x91   :  { %v44_v33 = vpop.xlane.xlu1 %43 }
  0x92   :  { %v32_v35 = vpop.xlane.xlu0 %31  ;;  %v58_v48 = vmul.f32 0.0051020407, %v44_v33 }
  0x93   :  { %v54_v51 = vmul.f32 0.0051020407, %v32_v35 }
  0x94   :  { %v104_v58 = vrot.slane %v58_v48, %v78_v47 }
  0x95   :  { %v47_v37 = vpop.xlane.xlu1 %46  ;;  %v79_v62 = vrot.slane %v54_v51, %v78_v47 }
  0x96   :  { %v35_v40 = vpop.xlane.xlu0 %34  ;;  %v59_v42 = vmul.f32 0.0051020407, %v47_v37  ;;  %v302_v37 = vsub.s32 1, %v526_v39 }
  0x97   :  { %v55_v44 = vmul.f32 0.0051020407, %v35_v40 }
  0x98   :  { %v108_v53 = vrot.slane %v59_v42, %v83_v41 }
  0x99   :  { %v50_v46 = vpop.xlane.xlu1 %49  ;;  %v84_v55 = vrot.slane %v55_v44, %v83_v41 }
  0x9a   :  { %v60_v49 = vmul.f32 0.0051020407, %v50_v46  ;;  %v38_v50 = vpop.xlane.xlu0 %37  ;;  %v109_v3 = vsel %vm85_vm1, %v108_v53, %v104_v58 }
  0x9b   :  { %v56_v52 = vmul.f32 0.0051020407, %v38_v50  ;;  %v86_v10 = vsel %vm85_vm1, %v84_v55, %v79_v62 }
  0x9c   :  { %v113_v56 = vrot.slane %v60_v49, %v90_v45 }
  0x9d   :  { %v53_v57 = vpop.xlane.xlu1 %52  ;;  %v91_v59 = vrot.slane %v56_v52, %v90_v45 }
  0x9e   :  { %v61_v60 = vmul.f32 0.0051020407, %v53_v57  ;;  %v41_v61 = vpop.xlane.xlu0 %40  ;;  %v114_v11 = vsel %vm92_vm2, %v113_v56, %v109_v3 }
  0x9f   :  { %v57_v63 = vmul.f32 0.0051020407, %v41_v61  ;;  %v93_v17 = vsel %vm92_vm2, %v91_v59, %v86_v10 }
  0xa0   :  { %v118_v7 = vrot.slane %v61_v60, %v97_v54 }
  0xa1   :  { %v98_v16 = vrot.slane %v57_v63, %v97_v54 }
  0xa2   :  { %v119_v22 = vsel %vm99_vm3, %v118_v7, %v114_v11 }
  0xa3   :  { %v100_v23 = vsel %vm99_vm3, %v98_v16, %v93_v17 }
  0xa4   :  { %v121_v24 = vsel %vm120_vm4, %v119_v22, %v100_v23 }
  0xa5   :  { %375 = vmatmul.mubr.msk.f32.vlgmr.msra.gmra.mrb[0].mxu0 %vm122_vm5, %v121_v24 }
 0x178   :  { %v191_v26 = vpop.f32.mrb[0].mxu0 }
 0x179   :  { %v195_v27 = vmax.f32 %v191_v26, 0.0  ;;  %v376_v28 = vpop.f32.mrb[1].mxu0 }
 0x17b   :  { %380 = vmatmul.mubr.msk.f32.vlgmr.msra.gmra.mrb[0].mxu1 %vm197_vm7, %v195_v27 }
 0x24e   :  { %v271_v29 = vpop.f32.mrb[0].mxu1 }
 0x24f   :  { %v358_v30 = vmul.f32 -1.442695, %v271_v29  ;;  %v381_v31 = vpop.f32.mrb[1].mxu1 }
 0x251   :  { %391 = vpow2.f32 %v358_v30 }
 0x25b   :  { %v392_v32 = vpop.eup %391 }
 0x25c   :  { %v278_v33 = vadd.f32 1.0, %v392_v32 }
 0x25e   :  { %393 = vrcp.f32 %v278_v33 }
 0x268   :  { %v394_v35 = vpop.eup %393 }
 0x269   :  { %v284_v36 = vrot.slane %v394_v35, %v283_v34  ;;  %v303_v38 = vrot.slane %v394_v35, %v302_v37 }
 0x26b   :  { %290 = vbcast.lane.b32.xlu1 %v284_v36, 264  ;;  %286 = vbcast.lane.b32.xlu0 %v284_v36, 256 }
 0x26f   :  { %294 = vbcast.lane.b32.xlu1 %v284_v36, 272  ;;  %305 = vbcast.lane.b32.xlu0 %v303_v38, 256 }
 0x273   :  { %298 = vbcast.lane.b32.xlu1 %v284_v36, 280  ;;  %313 = vbcast.lane.b32.xlu0 %v303_v38, 272 }
 0x277   :  { %309 = vbcast.lane.b32.xlu1 %v303_v38, 264 }
 0x27b   :  { %317 = vbcast.lane.b32.xlu1 %v303_v38, 280 }
 0x2dd   :  { %v291_v40 = vpop.permute.xlu1 %290  ;;  %v287_v41 = vpop.permute.xlu0 %286 }
 0x2de   :  { %v321_v42 = vmul.f32 %v291_v40, %v455_v8  ;;  %v322_v43 = vmul.f32 %v291_v40, %v460_v9  ;;  %v319_v44 = vmul.f32 %v287_v41, %v431_v2  ;;  %v320_v45 = vmul.f32 %v287_v41, %v438_v4 }
 0x2e0   :  { %337 = vst [vmem:[%s604_s3 + $0x10] sm:$0xff] %v321_v42  ;;  %338 = vst [vmem:[%s604_s3 + $0x18] sm:$0xff] %v322_v43 }
 0x2e1   :  { %335 = vst [vmem:[%s604_s3] sm:$0xff] %v319_v44  ;;  %336 = vst [vmem:[%s604_s3 + $0x8] sm:$0xff] %v320_v45  ;;  %v295_v8 = vpop.permute.xlu1 %294  ;;  %v306_v2 = vpop.permute.xlu0 %305 }
 0x2e2   :  { %v323_v4 = vmul.f32 %v295_v8, %v479_v14  ;;  %v324_v9 = vmul.f32 %v295_v8, %v484_v15  ;;  %v327_v39 = vmul.f32 %v306_v2, %v421_v0  ;;  %v328_v46 = vmul.f32 %v306_v2, %v426_v1 }
 0x2e4   :  { %339 = vst [vmem:[%s604_s3 + $0x20] sm:$0xff] %v323_v4  ;;  %340 = vst [vmem:[%s604_s3 + $0x28] sm:$0xff] %v324_v9 }
 0x2e5   :  { %343 = vst [vmem:[%s604_s3 + $0x40] sm:$0xff] %v327_v39  ;;  %344 = vst [vmem:[%s604_s3 + $0x48] sm:$0xff] %v328_v46  ;;  %v299_v14 = vpop.permute.xlu1 %298  ;;  %v314_v0 = vpop.permute.xlu0 %313 }
 0x2e6   :  { %v325_v1 = vmul.f32 %v299_v14, %v503_v20  ;;  %v326_v15 = vmul.f32 %v299_v14, %v508_v21  ;;  %v331_v47 = vmul.f32 %v314_v0, %v469_v12  ;;  %v332_v48 = vmul.f32 %v314_v0, %v474_v13 }
 0x2e8   :  { %341 = vst [vmem:[%s604_s3 + $0x30] sm:$0xff] %v325_v1  ;;  %342 = vst [vmem:[%s604_s3 + $0x38] sm:$0xff] %v326_v15 }
 0x2e9   :  { %347 = vst [vmem:[%s604_s3 + $0x60] sm:$0xff] %v331_v47  ;;  %348 = vst [vmem:[%s604_s3 + $0x68] sm:$0xff] %v332_v48  ;;  %v310_v20 = vpop.permute.xlu1 %309 }
 0x2ea   :  { %v329_v12 = vmul.f32 %v310_v20, %v443_v5  ;;  %v330_v13 = vmul.f32 %v310_v20, %v448_v6 }
 0x2ec   :  { %345 = vst [vmem:[%s604_s3 + $0x50] sm:$0xff] %v329_v12  ;;  %346 = vst [vmem:[%s604_s3 + $0x58] sm:$0xff] %v330_v13 }
 0x2ed   :  { %v318_v21 = vpop.permute.xlu1 %317 }
 0x2ee   :  { %v333_v49 = vmul.f32 %v318_v21, %v493_v18  ;;  %v334_v50 = vmul.f32 %v318_v21, %v498_v19 }
 0x2f0   :  { %349 = vst [vmem:[%s604_s3 + $0x70] sm:$0xff] %v333_v49  ;;  %350 = vst [vmem:[%s604_s3 + $0x78] sm:$0xff] %v334_v50 }

</bundles_post_ra>
